<compile_context>
chip_gen: v7x
topology: tpu7x:2x2x1
jax: 0.10.0
libtpu: 0.0.40
codegen_flags: <defaults>
</compile_context>

<pallas_src>
import functools

import jax
import jax.numpy as jnp
from jax.experimental import pallas as pl
from jax.experimental.pallas import tpu as pltpu

LANE = 128
H1, H2 = 400, 300  # logical hidden widths (match the PyTorch module)


def _round_up(x, m):
    return (x + m - 1) // m * m


def _actor_kernel(s_ref, w1_ref, b1_ref, w2_ref, b2_ref, w3_ref, b3_ref,
                  out_ref, *, max_action):
    # Layer 1: Linear(state_size, 512) + ReLU.  bf16 MXU operands, f32 accum.
    x = s_ref[...].astype(jnp.bfloat16)
    h1 = jnp.dot(x, w1_ref[...], preferred_element_type=jnp.float32)
    # Fused bias-add + ReLU + bf16 downcast (single bf16 intermediate kept).
    h1 = jnp.maximum(h1 + b1_ref[...], 0.0).astype(jnp.bfloat16)
    # Layer 2: Linear(512, 384) + ReLU.
    h2 = jnp.dot(h1, w2_ref[...], preferred_element_type=jnp.float32)
    h2 = jnp.maximum(h2 + b2_ref[...], 0.0).astype(jnp.bfloat16)
    # Layer 3: Linear(384, 128) + Tanh, scaled by max_action (f32 epilogue).
    o = jnp.dot(h2, w3_ref[...], preferred_element_type=jnp.float32)
    o = jnp.tanh(o + b3_ref[...]) * max_action
    out_ref[...] = o.astype(out_ref.dtype)


def init_actor_params(key, state_size, action_size):
    """f32, unpadded, (in, out)-layout params mimicking nn.Linear defaults
    (uniform(-1/sqrt(fan_in), 1/sqrt(fan_in)))."""
    def linear(k, fan_in, fan_out):
        kw, kb = jax.random.split(k)
        bound = 1.0 / jnp.sqrt(float(fan_in))
        w = jax.random.uniform(kw, (fan_in, fan_out), jnp.float32, -bound, bound)
        b = jax.random.uniform(kb, (1, fan_out), jnp.float32, -bound, bound)
        return w, b

    k1, k2, k3 = jax.random.split(key, 3)
    w1, b1 = linear(k1, state_size, H1)
    w2, b2 = linear(k2, H1, H2)
    w3, b3 = linear(k3, H2, action_size)
    return (w1, b1, w2, b2, w3, b3)


def prepare_actor_params(params):
    """Zero-pad matmul output dims (and matching K dims) to multiples of 128.
    W1's K stays at the logical state_size (no wrapper-side lane padding of s).
    Weights -> bf16, biases stay f32.  Done once, outside the forward."""
    w1, b1, w2, b2, w3, b3 = params
    s_in = w1.shape[0]                       # K of layer 1 kept logical
    h1p = _round_up(w1.shape[1], LANE)       # 400 -> 512
    h2p = _round_up(w2.shape[1], LANE)       # 300 -> 384
    ap = _round_up(w3.shape[1], LANE)        # action_size -> 128

    def pad_w(w, r, c):
        out = jnp.zeros((r, c), jnp.float32).at[:w.shape[0], :w.shape[1]].set(w)
        return out.astype(jnp.bfloat16)

    def pad_b(b, c):
        return jnp.zeros((1, c), jnp.float32).at[:, :b.shape[1]].set(b)

    return (pad_w(w1, s_in, h1p), pad_b(b1, h1p),
            pad_w(w2, h1p, h2p), pad_b(b2, h2p),
            pad_w(w3, h2p, ap), pad_b(b3, ap))


def actor_forward(s, padded_params, max_action, action_size):
    """s: (B, state_size) float32.  Returns (B, action_size) float32."""
    w1, b1, w2, b2, w3, b3 = padded_params
    B, s_in = s.shape
    assert w1.shape[0] == s_in, "padded params do not match state size"
    h1p, h2p, ap = w1.shape[1], w2.shape[1], w3.shape[1]

    # Batch tiling:
    #  * up to 1024 rows per step (amortizes ~0.35 us/step pipeline overhead,
    #    fits comfortably in scoped VMEM on all generations),
    #  * >= 2 grid steps once B >= 512 so v7x's two TensorCores both get work,
    #  * tb derived from B so padding is < 8 rows per step.
    if B >= 512:
        n_steps = max(pl.cdiv(B, 1024), 2)
    else:
        n_steps = 1
    tb = _round_up(pl.cdiv(max(B, 1), n_steps), 8)
    b_pad = n_steps * tb

    # Only row-pad the state; the lane dim stays at the logical state_size.
    if b_pad != B:
        s_p = jnp.zeros((b_pad, s_in), jnp.float32).at[:B, :].set(s)
    else:
        s_p = s

    kernel = functools.partial(_actor_kernel, max_action=float(max_action))

    const = lambda i: (0, 0)
    weight_specs = [
        pl.BlockSpec(w1.shape, const), pl.BlockSpec(b1.shape, const),
        pl.BlockSpec(w2.shape, const), pl.BlockSpec(b2.shape, const),
        pl.BlockSpec(w3.shape, const), pl.BlockSpec(b3.shape, const),
    ]

    # Advisory cost estimate (logical dims; padded lanes excluded).
    flops = 2 * B * (s_in * H1 + H1 * H2 + H2 * action_size)
    transcendentals = B * action_size
    bytes_accessed = (s_p.size * 4 + b_pad * ap * 4
                      + (w1.size + w2.size + w3.size) * 2
                      + (b1.size + b2.size + b3.size) * 4)

    out_p = pl.pallas_call(
        kernel,
        out_shape=jax.ShapeDtypeStruct((b_pad, ap), jnp.float32),
        grid=(n_steps,),
        in_specs=[pl.BlockSpec((tb, s_in), lambda i: (i, 0))] + weight_specs,
        out_specs=pl.BlockSpec((tb, ap), lambda i: (i, 0)),
        compiler_params=pltpu.CompilerParams(
            dimension_semantics=("parallel",),
            # Raise v5e's 16 MiB scoped-VMEM default so the 1024-row tile
            # fits; this equals the v6e/v7x default so it is a no-op there.
            vmem_limit_bytes=32 * 1024 * 1024),
        cost_estimate=pl.CostEstimate(
            flops=flops,
            transcendentals=transcendentals,
            bytes_accessed=bytes_accessed),
    )(s_p, w1, b1, w2, b2, w3, b3)

    return out_p[:B, :action_size]


def actor_reference(s, params, max_action):
    w1, b1, w2, b2, w3, b3 = params
    h1 = jnp.maximum(s @ w1 + b1, 0.0)
    h2 = jnp.maximum(h1 @ w2 + b2, 0.0)
    return max_action * jnp.tanh(h2 @ w3 + b3)


if __name__ == "__main__":
    key = jax.random.PRNGKey(0)
    k_param, k_state = jax.random.split(key)

    batch = 4
    state_size = 16
    action_size = 4
    max_action = 2.0

    params = init_actor_params(k_param, state_size, action_size)
    padded_params = prepare_actor_params(params)
    s = jax.random.normal(k_state, (batch, state_size), jnp.float32)

    out = actor_forward(s, padded_params, max_action, action_size)
    out = jax.block_until_ready(out)

    ref = actor_reference(s, params, max_action)
    assert out.shape == (batch, action_size)
    # bf16 MXU operands / intermediates -> compare against the f32 reference
    # with a bf16-level tolerance; outputs are tanh-bounded so this is tight.
    assert jnp.allclose(out, ref, atol=2e-2, rtol=2e-2), "mismatch vs reference"

    print("KERNEL_OK")
</pallas_src>

<mosaic_0001>
module attributes {stable_mosaic.version = 11 : i64} {
  func.func @_actor_kernel(%arg0: i32, %arg1: memref<8x16xf32, #tpu.memory_space<vmem>>, %arg2: memref<16x512xbf16, #tpu.memory_space<vmem>>, %arg3: memref<1x512xf32, #tpu.memory_space<vmem>>, %arg4: memref<512x384xbf16, #tpu.memory_space<vmem>>, %arg5: memref<1x384xf32, #tpu.memory_space<vmem>>, %arg6: memref<384x128xbf16, #tpu.memory_space<vmem>>, %arg7: memref<1x128xf32, #tpu.memory_space<vmem>>, %arg8: memref<8x128xf32, #tpu.memory_space<vmem>>) attributes {dimension_semantics = [#tpu.dimension_semantics<parallel>], iteration_bounds = array<i64: 1>, scalar_prefetch = 0 : i64, scratch_operands = 0 : i64, tpu.core_type = #tpu.core_type<tc>, window_params = [{transform_indices = @transform_0, window_bounds = array<i64: 8, 16>}, {pipeline_mode = #tpu.pipeline_mode<synchronous>, transform_indices = @transform_1, window_bounds = array<i64: 16, 512>}, {pipeline_mode = #tpu.pipeline_mode<synchronous>, transform_indices = @transform_2, window_bounds = array<i64: 1, 512>}, {pipeline_mode = #tpu.pipeline_mode<synchronous>, transform_indices = @transform_3, window_bounds = array<i64: 512, 384>}, {pipeline_mode = #tpu.pipeline_mode<synchronous>, transform_indices = @transform_4, window_bounds = array<i64: 1, 384>}, {pipeline_mode = #tpu.pipeline_mode<synchronous>, transform_indices = @transform_5, window_bounds = array<i64: 384, 128>}, {pipeline_mode = #tpu.pipeline_mode<synchronous>, transform_indices = @transform_6, window_bounds = array<i64: 1, 128>}, {transform_indices = @transform_7, window_bounds = array<i64: 8, 128>}]} {
    %c0 = arith.constant 0 : index
    %c0_0 = arith.constant 0 : index
    %0 = vector.load %arg1[%c0, %c0_0] : memref<8x16xf32, #tpu.memory_space<vmem>>, vector<8x16xf32>
    %1 = arith.truncf %0 : vector<8x16xf32> to vector<8x16xbf16>
    %c0_1 = arith.constant 0 : index
    %c0_2 = arith.constant 0 : index
    %2 = vector.load %arg2[%c0_1, %c0_2] : memref<16x512xbf16, #tpu.memory_space<vmem>>, vector<16x512xbf16>
    %cst = arith.constant dense<0.000000e+00> : vector<8x512xf32>
    %3 = tpu.matmul %1, %2, %cst {dimension_numbers = #tpu.dot_dimension_numbers<[1], [0], [0], [1], [0, 0, 1, 1], [], []>} : vector<8x16xbf16>, vector<16x512xbf16>, vector<8x512xf32> -> vector<8x512xf32>
    %c0_3 = arith.constant 0 : index
    %c0_4 = arith.constant 0 : index
    %4 = vector.load %arg3[%c0_3, %c0_4] : memref<1x512xf32, #tpu.memory_space<vmem>>, vector<1x512xf32>
    %5 = vector.broadcast %4 : vector<1x512xf32> to vector<8x512xf32>
    %6 = arith.addf %3, %5 : vector<8x512xf32>
    %cst_5 = arith.constant 0.000000e+00 : f32
    %7 = vector.broadcast %cst_5 : f32 to vector<8x512xf32>
    %8 = arith.maximumf %6, %7 : vector<8x512xf32>
    %9 = arith.truncf %8 : vector<8x512xf32> to vector<8x512xbf16>
    %c0_6 = arith.constant 0 : index
    %c0_7 = arith.constant 0 : index
    %10 = vector.load %arg4[%c0_6, %c0_7] : memref<512x384xbf16, #tpu.memory_space<vmem>>, vector<512x384xbf16>
    %cst_8 = arith.constant dense<0.000000e+00> : vector<8x384xf32>
    %11 = tpu.matmul %9, %10, %cst_8 {dimension_numbers = #tpu.dot_dimension_numbers<[1], [0], [0], [1], [0, 0, 1, 1], [], []>} : vector<8x512xbf16>, vector<512x384xbf16>, vector<8x384xf32> -> vector<8x384xf32>
    %c0_9 = arith.constant 0 : index
    %c0_10 = arith.constant 0 : index
    %12 = vector.load %arg5[%c0_9, %c0_10] : memref<1x384xf32, #tpu.memory_space<vmem>>, vector<1x384xf32>
    %13 = vector.broadcast %12 : vector<1x384xf32> to vector<8x384xf32>
    %14 = arith.addf %11, %13 : vector<8x384xf32>
    %cst_11 = arith.constant 0.000000e+00 : f32
    %15 = vector.broadcast %cst_11 : f32 to vector<8x384xf32>
    %16 = arith.maximumf %14, %15 : vector<8x384xf32>
    %17 = arith.truncf %16 : vector<8x384xf32> to vector<8x384xbf16>
    %c0_12 = arith.constant 0 : index
    %c0_13 = arith.constant 0 : index
    %18 = vector.load %arg6[%c0_12, %c0_13] : memref<384x128xbf16, #tpu.memory_space<vmem>>, vector<384x128xbf16>
    %cst_14 = arith.constant dense<0.000000e+00> : vector<8x128xf32>
    %19 = tpu.matmul %17, %18, %cst_14 {dimension_numbers = #tpu.dot_dimension_numbers<[1], [0], [0], [1], [0, 0, 1, 1], [], []>} : vector<8x384xbf16>, vector<384x128xbf16>, vector<8x128xf32> -> vector<8x128xf32>
    %c0_15 = arith.constant 0 : index
    %c0_16 = arith.constant 0 : index
    %20 = vector.load %arg7[%c0_15, %c0_16] : memref<1x128xf32, #tpu.memory_space<vmem>>, vector<1x128xf32>
    %21 = vector.broadcast %20 : vector<1x128xf32> to vector<8x128xf32>
    %22 = arith.addf %19, %21 : vector<8x128xf32>
    %23 = math.tanh %22 : vector<8x128xf32>
    %cst_17 = arith.constant 2.000000e+00 : f32
    %24 = vector.broadcast %cst_17 : f32 to vector<8x128xf32>
    %25 = arith.mulf %23, %24 : vector<8x128xf32>
    %c0_18 = arith.constant 0 : index
    %c0_19 = arith.constant 0 : index
    %26 = vector.load %arg8[%c0_18, %c0_19] : memref<8x128xf32, #tpu.memory_space<vmem>>, vector<8x128xf32>
    tpu.vector_store %arg8[%c0_18, %c0_19], %25 {strides = array<i32>} : memref<8x128xf32, #tpu.memory_space<vmem>>, vector<8x128xf32>,
    return
  }
  func.func @transform_0(%arg0: i32) -> (i32, i32) {
    %c0_i32 = arith.constant 0 : i32
    %c0_i32_0 = arith.constant 0 : i32
    return %arg0, %c0_i32 : i32, i32
  }
  func.func @transform_1(%arg0: i32) -> (i32, i32) {
    %c0_i32 = arith.constant 0 : i32
    %c0_i32_0 = arith.constant 0 : i32
    %c0_i32_1 = arith.constant 0 : i32
    return %c0_i32, %c0_i32_0 : i32, i32
  }
  func.func @transform_2(%arg0: i32) -> (i32, i32) {
    %c0_i32 = arith.constant 0 : i32
    %c0_i32_0 = arith.constant 0 : i32
    %c0_i32_1 = arith.constant 0 : i32
    return %c0_i32, %c0_i32_0 : i32, i32
  }
  func.func @transform_3(%arg0: i32) -> (i32, i32) {
    %c0_i32 = arith.constant 0 : i32
    %c0_i32_0 = arith.constant 0 : i32
    %c0_i32_1 = arith.constant 0 : i32
    return %c0_i32, %c0_i32_0 : i32, i32
  }
  func.func @transform_4(%arg0: i32) -> (i32, i32) {
    %c0_i32 = arith.constant 0 : i32
    %c0_i32_0 = arith.constant 0 : i32
    %c0_i32_1 = arith.constant 0 : i32
    return %c0_i32, %c0_i32_0 : i32, i32
  }
  func.func @transform_5(%arg0: i32) -> (i32, i32) {
    %c0_i32 = arith.constant 0 : i32
    %c0_i32_0 = arith.constant 0 : i32
    %c0_i32_1 = arith.constant 0 : i32
    return %c0_i32, %c0_i32_0 : i32, i32
  }
  func.func @transform_6(%arg0: i32) -> (i32, i32) {
    %c0_i32 = arith.constant 0 : i32
    %c0_i32_0 = arith.constant 0 : i32
    %c0_i32_1 = arith.constant 0 : i32
    return %c0_i32, %c0_i32_0 : i32, i32
  }
  func.func @transform_7(%arg0: i32) -> (i32, i32) {
    %c0_i32 = arith.constant 0 : i32
    %c0_i32_0 = arith.constant 0 : i32
    return %arg0, %c0_i32 : i32, i32
  }
}

</mosaic_0001>

<bundles_post_ra>
// kernel: tpu_custom_call.1
= control target key start
LH: loop header
LB: loop body
LE: loop exit
PB: predicated region body
PF: predicated region fallthrough
CT: control target
= control target key end

     0   :  { %12 = vsyncpa [#allocation3], 0  ;;  %s2017_s0 = inlined_call_operand.hbm [shape: f32[8,16], index: 0, kind: input, shape index: {}]   ;;  %s2018_s1 = inlined_call_operand.hbm [shape: bf16[16,512], index: 1, kind: input, shape index: {}]   ;;  %s2019_s2 = inlined_call_operand.vmem [shape: f32[1,512], index: 2, kind: input, shape index: {}]   ;;  %s2020_s3 = inlined_call_operand.hbm [shape: bf16[512,384], index: 3, kind: input, shape index: {}]   ;;  %s2021_s4 = inlined_call_operand.vmem [shape: f32[1,384], index: 4, kind: input, shape index: {}]   ;;  %s2022_s5 = inlined_call_operand.hbm [shape: bf16[384,128], index: 5, kind: input, shape index: {}]   ;;  %s2023_s6 = inlined_call_operand.vmem [shape: f32[1,128], index: 6, kind: input, shape index: {}]   ;;  %s2024_s7 = inlined_call_operand.hbm [shape: f32[8,128], index: 7, kind: output, shape index: {}]  }
   0x1   :  { %13 = vsyncpa [#allocation6], 0 }
   0x2   :  { %14 = vsyncpa [#allocation9], 0 }
   0x3   :  { %15 = vsyncpa [#allocation4], 0  ;;  %s1867_s24 = smov [#allocation5]   ;;  %s1749_s28 = scalar_lea.hbm %s2018_s1, 512 }
   0x4   :  { %s31_s25 = sshll.u32 %s1867_s24, 4  ;;  %p1750_p0 = scmp.ne.s32.totalorder %s2018_s1, %s1749_s28  ;;  %s32_s25 = int_to_ptr.vmem [resolvable:$true] %s31_s25 }
   0x5   :  { %p1753_p1 = scmp.lt.u32.totalorder %s1749_s28, %s2018_s1 }
   0x7   :  { %p1755_p2 = pnand %p1753_p1, %p1750_p0 }
   0x9   :  { %1758 = shalt.err (!%p1755_p2)
}
   0xa   :  { %s1759_s10 = scalar_lea.vmem %s32_s25, 512  ;;  %p1764_p4 = scmp.lt.s32.totalorder %s32_s25, %s32_s25 }
   0xb   :  { %p1760_p3 = scmp.ne.s32.totalorder %s32_s25, %s1759_s10  ;;  %p1765_p5 = scmp.lt.s32.totalorder %s1759_s10, %s1759_s10 }
   0xd   :  { %p1766_p6 = por %p1765_p5, %p1764_p4 }
   0xf   :  { %p1767_p7 = pnand %p1766_p6, %p1760_p3 }
  0x11   :  { %1770 = shalt.err (!%p1767_p7)
}
  0x12   :  { %s1868_s11 = smov 256   ;;  %s1869_s12 = smov 16  }
  0x13   :  { %37 = dma.hbm_to_vmem [thread:$0]  %s2018_s1, 512, %s32_s25, [#allocation6], %s1868_s11, %s1868_s11, %s1869_s12  }
  0x14   :  { %s1870_s15 = smov [#allocation2]   ;;  %s1871_s17 = smov [#allocation7]  }
  0x15   :  { %s22_s16 = sshll.u32 %s1870_s15, 4  ;;  %s45_s18 = sshll.u32 %s1871_s17, 4  ;;  %s23_s16 = int_to_ptr.vmem [resolvable:$true] %s22_s16  ;;  %s46_s18 = int_to_ptr.vmem [resolvable:$true] %s45_s18 }
  0x16   :  { %s1771_s21 = scalar_lea.hbm %s2017_s0, 128 }
  0x17   :  { %p1772_p8 = scmp.ne.s32.totalorder %s2017_s0, %s1771_s21  ;;  %p1775_p9 = scmp.lt.u32.totalorder %s1771_s21, %s2017_s0 }
  0x19   :  { %p1777_p10 = pnand %p1775_p9, %p1772_p8 }
  0x1b   :  { %1780 = shalt.err (!%p1777_p10)
}
  0x1c   :  { %s1781_s1 = scalar_lea.vmem %s23_s16, 128  ;;  %p1786_p12 = scmp.lt.s32.totalorder %s23_s16, %s23_s16 }
  0x1d   :  { %p1782_p11 = scmp.ne.s32.totalorder %s23_s16, %s1781_s1  ;;  %p1787_p13 = scmp.lt.s32.totalorder %s1781_s1, %s1781_s1 }
  0x1f   :  { %p1788_p0 = por %p1787_p13, %p1786_p12 }
  0x21   :  { %p1789_p1 = pnand %p1788_p0, %p1782_p11 }
  0x23   :  { %1792 = shalt.err (!%p1789_p1)
}
  0x24   :  { %25 = dma.hbm_to_vmem [thread:$0]  %s2017_s0, 128, %s23_s16, [#allocation3]  }
  0x25   :  { %s1793_s30 = scalar_lea.hbm %s2020_s3, 12288 }
  0x26   :  { %p1794_p2 = scmp.ne.s32.totalorder %s2020_s3, %s1793_s30  ;;  %p1797_p3 = scmp.lt.u32.totalorder %s1793_s30, %s2020_s3 }
  0x28   :  { %p1799_p4 = pnand %p1797_p3, %p1794_p2 }
  0x2a   :  { %1802 = shalt.err (!%p1799_p4)
}
  0x2b   :  { %s1803_s12 = scalar_lea.vmem %s46_s18, 12288  ;;  %p1808_p6 = scmp.lt.s32.totalorder %s46_s18, %s46_s18 }
  0x2c   :  { %p1804_p5 = scmp.ne.s32.totalorder %s46_s18, %s1803_s12  ;;  %p1809_p7 = scmp.lt.s32.totalorder %s1803_s12, %s1803_s12 }
  0x2e   :  { %p1810_p8 = por %p1809_p7, %p1808_p6 }
  0x30   :  { %p1811_p9 = pnand %p1810_p8, %p1804_p5 }
  0x32   :  { %1814 = shalt.err (!%p1811_p9)
}
  0x33   :  { %s1872_s0 = smov 192   ;;  %s1873_s13 = smov 12  }
  0x34   :  { %51 = dma.hbm_to_vmem [thread:$0]  %s2020_s3, 12288, %s46_s18, [#allocation6], %s1872_s0, %s1872_s0, %s1873_s13  }
  0x35   :  { %s1874_s16 = smov [#allocation8]   ;;  %s1815_s21 = scalar_lea.hbm %s2022_s5, 3072 }
  0x36   :  { %s59_s17 = sshll.u32 %s1874_s16, 4  ;;  %p1816_p10 = scmp.ne.s32.totalorder %s2022_s5, %s1815_s21  ;;  %s60_s17 = int_to_ptr.vmem [resolvable:$true] %s59_s17 }
  0x37   :  { %p1819_p11 = scmp.lt.u32.totalorder %s1815_s21, %s2022_s5 }
  0x39   :  { %p1821_p12 = pnand %p1819_p11, %p1816_p10 }
  0x3b   :  { %1824 = shalt.err (!%p1821_p12)
}
  0x3c   :  { %s1825_s1 = scalar_lea.vmem %s60_s17, 3072  ;;  %p1830_p0 = scmp.lt.s32.totalorder %s60_s17, %s60_s17 }
  0x3d   :  { %p1826_p13 = scmp.ne.s32.totalorder %s60_s17, %s1825_s1  ;;  %p1831_p1 = scmp.lt.s32.totalorder %s1825_s1, %s1825_s1 }
  0x3f   :  { %p1832_p2 = por %p1831_p1, %p1830_p0 }
  0x41   :  { %p1833_p3 = pnand %p1832_p2, %p1826_p13 }
  0x43   :  { %1836 = shalt.err (!%p1833_p3)
}
  0x44   :  { %s1875_s3 = smov 64   ;;  %s1876_s18 = smov 4  }
  0x45   :  { %65 = dma.hbm_to_vmem [thread:$0]  %s2022_s5, 3072, %s60_s17, [#allocation9], %s1875_s3, %s1875_s3, %s1876_s18  }
  0x46   :  { %1859 = dma.done.wait [#allocation3], 128  }
  0x47   :  { %1860 = vsyncadd [#allocation3], 4294967168 }
  0x48   :  { %1861 = dma.done.wait [#allocation6], 12800  }
  0x49   :  { %1862 = vsyncadd [#allocation6], 4294954496 }
  0x4a   :  { %1863 = dma.done.wait [#allocation9], 3072  }
  0x4b   :  { %1864 = vsyncadd [#allocation9], 4294964224  ;;  %v1877_v0 = vmov 0   ;;  %v1589_v1 = vld [vmem:[#allocation5 + $0x4] ss:$16 sps:$4 sm:$0xff]   ;;  %v81_v3 = vld [vmem:[#allocation2] sm:$0xff]  ;;  %v89_v57 = vlaneseq }
  0x4c   :  { %165 = vmatprep.mubr.bf16.mxu0 %v1877_v0  ;;  %206 = vmatprep.mubr.bf16.mxu1 %v1877_v0  ;;  %v1591_v2 = vld [vmem:[#allocation5] ss:$16 sps:$4 sm:$0xff]   ;;  %v82_v4 = vpack.c.bf16 %v81_v3, %v81_v3  ;;  %v1592_v5 = vld [vmem:[#allocation5 + $0xc] ss:$16 sps:$4 sm:$0xff]   ;;  %v1594_v6 = vld [vmem:[#allocation5 + $0x8] ss:$16 sps:$4 sm:$0xff]  }
  0x4d   :  { %133 = vmatprep.subr.bf16.mxu0 %v1589_v1  ;;  %vm129_vm0 = vcmask 130048   ;;  %v1595_v7 = vld [vmem:[#allocation7] ss:$12 sps:$4 sm:$0xff]   ;;  %174 = vmatprep.subr.bf16.mxu1 %v1592_v5  ;;  %v1597_v8 = vld [vmem:[#allocation7 + $0x4] ss:$12 sps:$4 sm:$0xff]   ;;  %v1969_v58 = vshrl.u32 %v89_v57, 7 }
  0x4e   :  { %134 = vmatpush1.bf16.msra.mxu0 %v1591_v2  ;;  %175 = vmatpush1.bf16.msra.mxu1 %v1594_v6  ;;  %v1600_v9 = vld [vmem:[#allocation7 + $0x1c] ss:$12 sps:$4 sm:$0xff]   ;;  %v1598_v10 = vld [vmem:[#allocation7 + $0x18] ss:$12 sps:$4 sm:$0xff]   ;;  %v1603_v11 = vld [vmem:[#allocation7 + $0x34] ss:$12 sps:$4 sm:$0xff]  }
  0x4f   :  { %880 = vmatprep.subr.bf16.mxu0 %v1597_v8  ;;  %v1601_v12 = vld [vmem:[#allocation7 + $0x30] ss:$12 sps:$4 sm:$0xff]   ;;  %v1606_v13 = vld [vmem:[#allocation7 + $0x4c] ss:$12 sps:$4 sm:$0xff]   ;;  %v1604_v14 = vld [vmem:[#allocation7 + $0x48] ss:$12 sps:$4 sm:$0xff]  }
  0x50   :  { %v1609_v15 = vld [vmem:[#allocation7 + $0x64] ss:$12 sps:$4 sm:$0xff]   ;;  %v1622_v16 = vld [vmem:[#allocation7 + $0xc8] ss:$12 sps:$4 sm:$0xff]   ;;  %v1607_v18 = vld [vmem:[#allocation7 + $0x60] ss:$12 sps:$4 sm:$0xff]  }
  0x51   :  { %1351 = vmatmul.mubr.msk.bf16.vlgmr.msra.gmra.mrb[0].mxu0 %vm129_vm0, %v82_v4  ;;  %1352 = vmatmul.mubr.msk.bf16.vlgmr.msra.gmra.mrb[0].mxu1 %vm129_vm0, %v82_v4  ;;  %v1623_v17 = vld [vmem:[#allocation7 + $0x8] ss:$12 sps:$4 sm:$0xff]   ;;  %v1627_v20 = vld [vmem:[#allocation7 + $0xe0] ss:$12 sps:$4 sm:$0xff]   ;;  %v1610_v22 = vld [vmem:[#allocation7 + $0x78] ss:$12 sps:$4 sm:$0xff]  }
  0x52   :  { %881 = vmatpush1.bf16.msra.mxu0 %v1595_v7  ;;  %1474 = vmatprep.subr.bf16.mxu1 %v1622_v16  ;;  %v1612_v19 = vld [vmem:[#allocation7 + $0x7c] ss:$12 sps:$4 sm:$0xff]   ;;  %v1628_v21 = vld [vmem:[#allocation7 + $0x20] ss:$12 sps:$4 sm:$0xff]   ;;  %v1632_v23 = vld [vmem:[#allocation7 + $0xf8] ss:$12 sps:$4 sm:$0xff]  }
  0x53   :  { %882 = vmatprep.subr.bf16.mxu0 %v1600_v9  ;;  %1475 = vmatpush3.bf16.msra.mxu1 %v1623_v17  ;;  %v1633_v24 = vld [vmem:[#allocation7 + $0x38] ss:$12 sps:$4 sm:$0xff]   ;;  %v1615_v25 = vld [vmem:[#allocation7 + $0x94] ss:$12 sps:$4 sm:$0xff]   ;;  %v1637_v26 = vld [vmem:[#allocation7 + $0x110] ss:$12 sps:$4 sm:$0xff]  }
  0x54   :  { %1476 = vmatprep.subr.bf16.mxu1 %v1627_v20  ;;  %v1638_v27 = vld [vmem:[#allocation7 + $0x50] ss:$12 sps:$4 sm:$0xff]   ;;  %v1618_v29 = vld [vmem:[#allocation7 + $0xac] ss:$12 sps:$4 sm:$0xff]   ;;  %v1642_v30 = vld [vmem:[#allocation7 + $0x128] ss:$12 sps:$4 sm:$0xff]  }
  0x55   :  { %v1613_v28 = vld [vmem:[#allocation7 + $0x90] ss:$12 sps:$4 sm:$0xff]   ;;  %v1643_v31 = vld [vmem:[#allocation7 + $0x68] ss:$12 sps:$4 sm:$0xff]   ;;  %v1647_v34 = vld [vmem:[#allocation7 + $0x140] ss:$12 sps:$4 sm:$0xff]  }
  0x56   :  { %883 = vmatpush1.bf16.msra.mxu0 %v1598_v10  ;;  %v1616_v32 = vld [vmem:[#allocation7 + $0xa8] ss:$12 sps:$4 sm:$0xff]   ;;  %v1621_v33 = vld [vmem:[#allocation7 + $0xc4] ss:$12 sps:$4 sm:$0xff]   ;;  %v1619_v35 = vld [vmem:[#allocation7 + $0xc0] ss:$12 sps:$4 sm:$0xff]  }
  0x57   :  { %884 = vmatprep.subr.bf16.mxu0 %v1603_v11  ;;  %1477 = vmatpush3.bf16.msra.mxu1 %v1628_v21  ;;  %v1648_v36 = vld [vmem:[#allocation7 + $0x80] ss:$12 sps:$4 sm:$0xff]   ;;  %v1626_v37 = vld [vmem:[#allocation7 + $0xdc] ss:$12 sps:$4 sm:$0xff]   ;;  %v1624_v38 = vld [vmem:[#allocation7 + $0xd8] ss:$12 sps:$4 sm:$0xff]  }
  0x58   :  { %1478 = vmatprep.subr.bf16.mxu1 %v1632_v23  ;;  %v1631_v39 = vld [vmem:[#allocation7 + $0xf4] ss:$12 sps:$4 sm:$0xff]   ;;  %v1629_v40 = vld [vmem:[#allocation7 + $0xf0] ss:$12 sps:$4 sm:$0xff]   ;;  %v1636_v41 = vld [vmem:[#allocation7 + $0x10c] ss:$12 sps:$4 sm:$0xff]  }
  0x59   :  { %v1634_v42 = vld [vmem:[#allocation7 + $0x108] ss:$12 sps:$4 sm:$0xff]   ;;  %v1641_v43 = vld [vmem:[#allocation7 + $0x124] ss:$12 sps:$4 sm:$0xff]   ;;  %v1639_v44 = vld [vmem:[#allocation7 + $0x120] ss:$12 sps:$4 sm:$0xff]  }
  0x5a   :  { %885 = vmatpush1.bf16.msra.mxu0 %v1601_v12  ;;  %v1646_v45 = vld [vmem:[#allocation7 + $0x13c] ss:$12 sps:$4 sm:$0xff]   ;;  %v1644_v46 = vld [vmem:[#allocation7 + $0x138] ss:$12 sps:$4 sm:$0xff]   ;;  %v1651_v47 = vld [vmem:[#allocation7 + $0x154] ss:$12 sps:$4 sm:$0xff]  }
  0x5b   :  { %886 = vmatprep.subr.bf16.mxu0 %v1606_v13  ;;  %1479 = vmatpush3.bf16.msra.mxu1 %v1633_v24  ;;  %v1652_v48 = vld [vmem:[#allocation7 + $0x158] ss:$12 sps:$4 sm:$0xff]   ;;  %v1649_v49 = vld [vmem:[#allocation7 + $0x150] ss:$12 sps:$4 sm:$0xff]   ;;  %v1654_v53 = vld [vmem:[#allocation7 + $0x168] ss:$12 sps:$4 sm:$0xff]  }
  0x5c   :  { %1480 = vmatprep.subr.bf16.mxu1 %v1637_v26  ;;  %v1653_v50 = vld [vmem:[#allocation7 + $0x98] ss:$12 sps:$4 sm:$0xff]   ;;  %v1657_v52 = vld [vmem:[#allocation7 + $0x170] ss:$12 sps:$4 sm:$0xff]   ;;  %v1662_v56 = vld [vmem:[#allocation7 + $0x248] ss:$12 sps:$4 sm:$0xff]  }
  0x5d   :  { %v1656_v51 = vld [vmem:[#allocation7 + $0x16c] ss:$12 sps:$4 sm:$0xff]   ;;  %v1658_v54 = vld [vmem:[#allocation7 + $0xb0] ss:$12 sps:$4 sm:$0xff]   ;;  %v91_v59 = vsub.s32 0, %v1969_v58  ;;  %v95_v61 = vsub.s32 1, %v1969_v58 }
  0x5e   :  { %887 = vmatpush1.bf16.msra.mxu0 %v1604_v14  ;;  %v1661_v55 = vld [vmem:[#allocation7 + $0x184] ss:$12 sps:$4 sm:$0xff]   ;;  %v1975_v60 = vld [vmem:[%s2019_s2] sm:$0xf]  ;;  %v103_v62 = vsub.s32 3, %v1969_v58  ;;  %vm1879_vm1 = vmmov 0  }
  0x5f   :  { %888 = vmatprep.subr.bf16.mxu0 %v1609_v15  ;;  %1481 = vmatpush3.bf16.msra.mxu1 %v1638_v27  ;;  %v92_v63 = vrot.slane %v1975_v60, %v91_v59  ;;  %v96_v0 = vrot.slane %v1975_v60, %v95_v61  ;;  %v1659_v16 = vld [vmem:[#allocation7 + $0x180] ss:$12 sps:$4 sm:$0xff]   ;;  %v1663_v17 = vld [vmem:[#allocation7 + $0x188] ss:$12 sps:$4 sm:$0xff]   ;;  %v1664_v23 = vld [vmem:[#allocation7 + $0x198] ss:$12 sps:$4 sm:$0xff]  }
  0x60   :  { %1482 = vmatprep.subr.bf16.mxu1 %v1642_v30  ;;  %v104_v2 = vrot.slane %v1975_v60, %v103_v62  ;;  %v1666_v20 = vld [vmem:[#allocation7 + $0x19c] ss:$12 sps:$4 sm:$0xff]   ;;  %v1667_v21 = vld [vmem:[#allocation7 + $0x260] ss:$12 sps:$4 sm:$0xff]   ;;  %v1672_v26 = vld [vmem:[#allocation7 + $0x278] ss:$12 sps:$4 sm:$0xff]  }
  0x61   :  { %v1668_v24 = vld [vmem:[#allocation7 + $0x1a0] ss:$12 sps:$4 sm:$0xff]   ;;  %v1669_v27 = vld [vmem:[#allocation7 + $0x1b0] ss:$12 sps:$4 sm:$0xff]   ;;  %v1702_v57 = vld [vmem:[#allocation7 + $0x258] ss:$12 sps:$4 sm:$0xff]  }
  0x62   :  { %889 = vmatpush1.bf16.msra.mxu0 %v1607_v18  ;;  %v1677_v30 = vld [vmem:[#allocation7 + $0x290] ss:$12 sps:$4 sm:$0xff]   ;;  %s1880_s8 = smov [#allocation10]  }
  0x63   :  { %890 = vmatprep.subr.bf16.mxu0 %v1612_v19  ;;  %1483 = vmatpush3.bf16.msra.mxu1 %v1643_v31  ;;  %v1674_v31 = vld [vmem:[#allocation7 + $0x1c8] ss:$12 sps:$4 sm:$0xff]   ;;  %v1705_v62 = vld [vmem:[#allocation7 + $0x270] ss:$12 sps:$4 sm:$0xff]   ;;  %s1336_s9 = sshll.u32 %s1880_s8, 4  ;;  %s1337_s9 = int_to_ptr.vmem [resolvable:$true] %s1336_s9 }
  0x64   :  { %1484 = vmatprep.subr.bf16.mxu1 %v1647_v34  ;;  %v1682_v34 = vld [vmem:[#allocation7 + $0x2a8] ss:$12 sps:$4 sm:$0xff]   ;;  %s1837_s10 = scalar_lea.vmem %s1337_s9, 128  ;;  %p1842_p5 = scmp.lt.s32.totalorder %s1337_s9, %s1337_s9 }
  0x65   :  { %p1838_p4 = scmp.ne.s32.totalorder %s1337_s9, %s1837_s10  ;;  %p1843_p6 = scmp.lt.s32.totalorder %s1837_s10, %s1837_s10 }
  0x66   :  { %891 = vmatpush1.bf16.msra.mxu0 %v1610_v22 }
  0x67   :  { %892 = vmatprep.subr.bf16.mxu0 %v1615_v25  ;;  %1485 = vmatpush3.bf16.msra.mxu1 %v1648_v36  ;;  %v1671_v25 = vld [vmem:[#allocation7 + $0x1b4] ss:$12 sps:$4 sm:$0xff]   ;;  %p1844_p7 = por %p1843_p6, %p1842_p5 }
  0x68   :  { %1486 = vmatprep.subr.bf16.mxu1 %v1652_v48  ;;  %v1679_v36 = vld [vmem:[#allocation7 + $0x1e0] ss:$12 sps:$4 sm:$0xff]  }
  0x69   :  { %v1696_v48 = vld [vmem:[#allocation7 + $0x22c] ss:$12 sps:$4 sm:$0xff]   ;;  %p1845_p8 = pnand %p1844_p7, %p1838_p4 }
  0x6a   :  { %893 = vmatpush1.bf16.msra.mxu0 %v1613_v28  ;;  %v1673_v28 = vld [vmem:[#allocation7 + $0x1b8] ss:$12 sps:$4 sm:$0xff]  }
  0x6b   :  { %894 = vmatprep.subr.bf16.mxu0 %v1618_v29  ;;  %1487 = vmatpush3.bf16.msra.mxu1 %v1653_v50  ;;  %v1676_v29 = vld [vmem:[#allocation7 + $0x1cc] ss:$12 sps:$4 sm:$0xff]  }
  0x6c   :  { %1488 = vmatprep.subr.bf16.mxu1 %v1657_v52  ;;  %v1698_v52 = vld [vmem:[#allocation7 + $0x230] ss:$12 sps:$4 sm:$0xff]  }
  0x6e   :  { %895 = vmatpush1.bf16.msra.mxu0 %v1616_v32  ;;  %v1678_v32 = vld [vmem:[#allocation7 + $0x1d0] ss:$12 sps:$4 sm:$0xff]  }
  0x6f   :  { %896 = vmatprep.subr.bf16.mxu0 %v1621_v33  ;;  %1489 = vmatpush3.bf16.msra.mxu1 %v1658_v54  ;;  %v1681_v33 = vld [vmem:[#allocation7 + $0x1e4] ss:$12 sps:$4 sm:$0xff]  }
  0x70   :  { %1496 = vmatprep.subr.bf16.mxu1 %v1662_v56  ;;  %v1704_v56 = vld [vmem:[#allocation7 + $0x25c] ss:$12 sps:$4 sm:$0xff]  }
  0x72   :  { %897 = vmatpush1.bf16.msra.mxu0 %v1619_v35  ;;  %v99_v35 = vsub.s32 2, %v1969_v58  ;;  %v1741_v58 = vld [vmem:[#allocation8 + $0x90] sm:$0xff]  }
  0x73   :  { %898 = vmatprep.subr.bf16.mxu0 %v1626_v37  ;;  %v1683_v37 = vld [vmem:[#allocation7 + $0x1e8] ss:$12 sps:$4 sm:$0xff]  }
  0x76   :  { %899 = vmatpush1.bf16.msra.mxu0 %v1624_v38  ;;  %v1686_v38 = vld [vmem:[#allocation7 + $0x1fc] ss:$12 sps:$4 sm:$0xff]  }
  0x77   :  { %900 = vmatprep.subr.bf16.mxu0 %v1631_v39  ;;  %v1687_v39 = vld [vmem:[#allocation7 + $0x2c0] ss:$12 sps:$4 sm:$0xff]  }
  0x7a   :  { %901 = vmatpush1.bf16.msra.mxu0 %v1629_v40  ;;  %v100_v40 = vrot.slane %v1975_v60, %v99_v35  ;;  %v1707_v60 = vld [vmem:[#allocation7 + $0x274] ss:$12 sps:$4 sm:$0xff]  }
  0x7b   :  { %902 = vmatprep.subr.bf16.mxu0 %v1636_v41  ;;  %v1684_v41 = vld [vmem:[#allocation7 + $0x1f8] ss:$12 sps:$4 sm:$0xff]  }
  0x7e   :  { %903 = vmatpush1.bf16.msra.mxu0 %v1634_v42  ;;  %v1688_v42 = vld [vmem:[#allocation7 + $0x200] ss:$12 sps:$4 sm:$0xff]  }
  0x7f   :  { %904 = vmatprep.subr.bf16.mxu0 %v1641_v43  ;;  %v1691_v43 = vld [vmem:[#allocation7 + $0x214] ss:$12 sps:$4 sm:$0xff]  }
  0x82   :  { %905 = vmatpush1.bf16.msra.mxu0 %v1639_v44  ;;  %v1692_v44 = vld [vmem:[#allocation7 + $0x2d8] ss:$12 sps:$4 sm:$0xff]  }
  0x83   :  { %906 = vmatprep.subr.bf16.mxu0 %v1646_v45 }
  0x86   :  { %907 = vmatpush1.bf16.msra.mxu0 %v1644_v46  ;;  %v1689_v46 = vld [vmem:[#allocation7 + $0x210] ss:$12 sps:$4 sm:$0xff]  }
  0x87   :  { %908 = vmatprep.subr.bf16.mxu0 %v1651_v47  ;;  %v1693_v47 = vld [vmem:[#allocation7 + $0x218] ss:$12 sps:$4 sm:$0xff]  }
  0x8a   :  { %909 = vmatpush1.bf16.msra.mxu0 %v1649_v49  ;;  %v1697_v49 = vld [vmem:[#allocation7 + $0x2f0] ss:$12 sps:$4 sm:$0xff]  }
  0x8b   :  { %910 = vmatprep.subr.bf16.mxu0 %v1656_v51  ;;  %v1694_v51 = vld [vmem:[#allocation7 + $0x228] ss:$12 sps:$4 sm:$0xff]  }
  0x8e   :  { %911 = vmatpush1.bf16.msra.mxu0 %v1654_v53  ;;  %v1701_v53 = vld [vmem:[#allocation7 + $0x244] ss:$12 sps:$4 sm:$0xff]  }
  0x8f   :  { %921 = vmatprep.subr.bf16.mxu0 %v1661_v55  ;;  %v1699_v55 = vld [vmem:[#allocation7 + $0x240] ss:$12 sps:$4 sm:$0xff]  }
 0x124   :  { %v167_v1 = vpop.f32.mrb[0].mxu0  ;;  %v1986_v7 = vpop.f32.mrb[0].mxu1 }
 0x125   :  { %v168_v3 = vadd.f32 %v167_v1, %v92_v63  ;;  %v169_v4 = vpop.f32.mrb[1].mxu0  ;;  %v210_v10 = vpop.f32.mrb[1].mxu1  ;;  %v209_v45 = vadd.f32 %v1986_v7, %v100_v40  ;;  %v1710_v63 = vld [vmem:[#allocation7 + $0x28c] ss:$12 sps:$4 sm:$0xff]   ;;  %v1713_v1 = vld [vmem:[#allocation7 + $0x2a4] ss:$12 sps:$4 sm:$0xff]  }
 0x126   :  { %v170_v5 = vadd.f32 %v169_v4, %v96_v0  ;;  %v171_v6 = vpop.f32.mrb[2].mxu0  ;;  %v211_v12 = vadd.f32 %v210_v10, %v104_v2  ;;  %v212_v13 = vpop.f32.mrb[2].mxu1  ;;  %v1708_v0 = vld [vmem:[#allocation7 + $0x288] ss:$12 sps:$4 sm:$0xff]   ;;  %v1711_v2 = vld [vmem:[#allocation7 + $0x2a0] ss:$12 sps:$4 sm:$0xff]  }
 0x127   :  { %v215_v8 = vmax.f32 %v168_v3, 0.0  ;;  %v172_v9 = vpop.f32.mrb[3].mxu0  ;;  %v213_v14 = vpop.f32.mrb[3].mxu1  ;;  %v217_v50 = vmax.f32 %v209_v45, 0.0  ;;  %v1716_v3 = vld [vmem:[#allocation7 + $0x2bc] ss:$12 sps:$4 sm:$0xff]  }
 0x128   :  { %v216_v11 = vmax.f32 %v170_v5, 0.0  ;;  %v218_v18 = vmax.f32 %v211_v12, 0.0  ;;  %v1714_v4 = vld [vmem:[#allocation7 + $0x2b8] ss:$12 sps:$4 sm:$0xff]   ;;  %v1719_v5 = vld [vmem:[#allocation7 + $0x2d4] ss:$12 sps:$4 sm:$0xff]  }
 0x129   :  { %v219_v19 = vpack.c.bf16 %v215_v8, %v215_v8  ;;  %v221_v54 = vpack.c.bf16 %v217_v50, %v217_v50  ;;  %v1717_v6 = vld [vmem:[#allocation7 + $0x2d0] ss:$12 sps:$4 sm:$0xff]   ;;  %v1722_v7 = vld [vmem:[#allocation7 + $0x2ec] ss:$12 sps:$4 sm:$0xff]   ;;  %v1720_v8 = vld [vmem:[#allocation7 + $0x2e8] ss:$12 sps:$4 sm:$0xff]  }
 0x12a   :  { %v220_v15 = vpack.c.bf16 %v216_v11, %v216_v11  ;;  %v222_v22 = vpack.c.bf16 %v218_v18, %v218_v18  ;;  %v1723_v9 = vld [vmem:[#allocation8 + $0x40] sm:$0xff]   ;;  %v1725_v11 = vld [vmem:[#allocation8 + $0x48] sm:$0xff]   ;;  %v1727_v13 = vld [vmem:[#allocation8 + $0x50] sm:$0xff]  }
 0x12b   :  { %v1724_v10 = vld [vmem:[#allocation8] sm:$0xff]   ;;  %v1726_v12 = vld [vmem:[#allocation8 + $0x8] sm:$0xff]   ;;  %v1728_v14 = vld [vmem:[#allocation8 + $0x10] sm:$0xff]  }
 0x12c   :  { %912 = vmatprep.mubr.bf16.mxu0 %v220_v15  ;;  %994 = vmatprep.mubr.bf16.mxu1 %v220_v15  ;;  %v1729_v15 = vld [vmem:[#allocation8 + $0x58] sm:$0xff]   ;;  %v1732_v18 = vld [vmem:[#allocation8 + $0x20] sm:$0xff]  }
 0x12d   :  { %913 = vmatmul.mubr.bf16.vlgmr.msra.gmra.mrb[4].mxu0 %v219_v19  ;;  %995 = vmatmul.mubr.bf16.vlgmr.msra.gmra.mrb[4].mxu1 %v219_v19  ;;  %v1733_v19 = vld [vmem:[#allocation8 + $0x68] sm:$0xff]  }
 0x12e   :  { %922 = vmatpush1.bf16.msra.mxu0 %v1659_v16  ;;  %1497 = vmatpush3.bf16.msra.mxu1 %v1663_v17  ;;  %v1730_v16 = vld [vmem:[#allocation8 + $0x18] sm:$0xff]   ;;  %v1731_v17 = vld [vmem:[#allocation8 + $0x60] sm:$0xff]  }
 0x12f   :  { %923 = vmatprep.subr.bf16.mxu0 %v1666_v20  ;;  %1498 = vmatprep.subr.bf16.mxu1 %v1667_v21  ;;  %v1734_v20 = vld [vmem:[#allocation8 + $0x28] sm:$0xff]   ;;  %v1735_v21 = vld [vmem:[#allocation8 + $0x70] sm:$0xff]  }
 0x130   :  { %1034 = vmatprep.mubr.bf16.mxu1 %v222_v22  ;;  %953 = vmatprep.mubr.bf16.mxu0 %v222_v22  ;;  %v1736_v22 = vld [vmem:[#allocation8 + $0x30] sm:$0xff]  }
 0x132   :  { %924 = vmatpush1.bf16.msra.mxu0 %v1664_v23  ;;  %1499 = vmatpush3.bf16.msra.mxu1 %v1668_v24  ;;  %v1737_v23 = vld [vmem:[#allocation8 + $0x78] sm:$0xff]  }
 0x133   :  { %925 = vmatprep.subr.bf16.mxu0 %v1671_v25  ;;  %1500 = vmatprep.subr.bf16.mxu1 %v1672_v26  ;;  %v1738_v24 = vld [vmem:[#allocation8 + $0x38] sm:$0xff]   ;;  %v1878_v25 = vmov 0.0  }
 0x136   :  { %926 = vmatpush1.bf16.msra.mxu0 %v1669_v27  ;;  %1501 = vmatpush3.bf16.msra.mxu1 %v1673_v28 }
 0x137   :  { %927 = vmatprep.subr.bf16.mxu0 %v1676_v29  ;;  %1502 = vmatprep.subr.bf16.mxu1 %v1677_v30 }
 0x13a   :  { %928 = vmatpush1.bf16.msra.mxu0 %v1674_v31  ;;  %1503 = vmatpush3.bf16.msra.mxu1 %v1678_v32  ;;  %v351_v31 = vld [vmem:[%s2021_s4] sm:$0x7] }
 0x13b   :  { %929 = vmatprep.subr.bf16.mxu0 %v1681_v33  ;;  %1504 = vmatprep.subr.bf16.mxu1 %v1682_v34  ;;  %v364_v32 = vrot.slane %v351_v31, %v99_v35 }
 0x13e   :  { %930 = vmatpush1.bf16.msra.mxu0 %v1679_v36  ;;  %1505 = vmatpush3.bf16.msra.mxu1 %v1683_v37 }
 0x13f   :  { %931 = vmatprep.subr.bf16.mxu0 %v1686_v38  ;;  %1506 = vmatprep.subr.bf16.mxu1 %v1687_v39 }
 0x142   :  { %932 = vmatpush1.bf16.msra.mxu0 %v1684_v41  ;;  %1507 = vmatpush3.bf16.msra.mxu1 %v1688_v42  ;;  %v356_v41 = vrot.slane %v351_v31, %v91_v59  ;;  %v360_v42 = vrot.slane %v351_v31, %v95_v61  ;;  %v1742_v59 = vld [vmem:[#allocation8 + $0x98] sm:$0xff]   ;;  %v1743_v61 = vld [vmem:[#allocation8 + $0xa0] sm:$0xff]  }
 0x143   :  { %933 = vmatprep.subr.bf16.mxu0 %v1691_v43  ;;  %1508 = vmatprep.subr.bf16.mxu1 %v1692_v44 }
 0x146   :  { %934 = vmatpush1.bf16.msra.mxu0 %v1689_v46  ;;  %1509 = vmatpush3.bf16.msra.mxu1 %v1693_v47 }
 0x147   :  { %935 = vmatprep.subr.bf16.mxu0 %v1696_v48  ;;  %1510 = vmatprep.subr.bf16.mxu1 %v1697_v49 }
 0x14a   :  { %936 = vmatpush1.bf16.msra.mxu0 %v1694_v51  ;;  %1511 = vmatpush3.bf16.msra.mxu1 %v1698_v52  ;;  %v1739_v51 = vld [vmem:[#allocation8 + $0x80] sm:$0xff]  }
 0x14b   :  { %937 = vmatprep.subr.bf16.mxu0 %v1701_v53  ;;  %1518 = vmatprep.subr.bf16.mxu1 %v1723_v9  ;;  %v1740_v53 = vld [vmem:[#allocation8 + $0x88] sm:$0xff]  }
 0x14d   :  { %1035 = vmatmul.mubr.bf16.vlgmr.msra.gmra.mrb[8].mxu1 %v221_v54 }
 0x14e   :  { %938 = vmatpush1.bf16.msra.mxu0 %v1699_v55  ;;  %1519 = vmatpush3.bf16.msra.mxu1 %v1724_v10  ;;  %v1745_v55 = vld [vmem:[#allocation8 + $0xb0] sm:$0xff]  }
 0x14f   :  { %939 = vmatprep.subr.bf16.mxu0 %v1704_v56  ;;  %1520 = vmatprep.subr.bf16.mxu1 %v1725_v11  ;;  %v1746_v56 = vld [vmem:[#allocation8 + $0xb8] sm:$0xff]  }
 0x152   :  { %940 = vmatpush1.bf16.msra.mxu0 %v1702_v57  ;;  %1521 = vmatpush3.bf16.msra.mxu1 %v1726_v12 }
 0x153   :  { %941 = vmatprep.subr.bf16.mxu0 %v1707_v60  ;;  %1522 = vmatprep.subr.bf16.mxu1 %v1727_v13 }
 0x156   :  { %942 = vmatpush1.bf16.msra.mxu0 %v1705_v62  ;;  %1523 = vmatpush3.bf16.msra.mxu1 %v1728_v14 }
 0x157   :  { %943 = vmatprep.subr.bf16.mxu0 %v1710_v63  ;;  %1524 = vmatprep.subr.bf16.mxu1 %v1729_v15 }
 0x15a   :  { %944 = vmatpush1.bf16.msra.mxu0 %v1708_v0  ;;  %1525 = vmatpush3.bf16.msra.mxu1 %v1730_v16 }
 0x15b   :  { %945 = vmatprep.subr.bf16.mxu0 %v1713_v1  ;;  %1526 = vmatprep.subr.bf16.mxu1 %v1731_v17 }
 0x15e   :  { %946 = vmatpush1.bf16.msra.mxu0 %v1711_v2  ;;  %1527 = vmatpush3.bf16.msra.mxu1 %v1732_v18 }
 0x15f   :  { %947 = vmatprep.subr.bf16.mxu0 %v1716_v3  ;;  %1528 = vmatprep.subr.bf16.mxu1 %v1733_v19  ;;  %v1449_v3 = vld [vmem:[%s2023_s6] ss:$0 sm:$0xff] }
 0x162   :  { %948 = vmatpush1.bf16.msra.mxu0 %v1714_v4  ;;  %1529 = vmatpush3.bf16.msra.mxu1 %v1734_v20 }
 0x163   :  { %949 = vmatprep.subr.bf16.mxu0 %v1719_v5  ;;  %1530 = vmatprep.subr.bf16.mxu1 %v1735_v21 }
 0x166   :  { %950 = vmatpush1.bf16.msra.mxu0 %v1717_v6  ;;  %1531 = vmatpush3.bf16.msra.mxu1 %v1736_v22 }
 0x167   :  { %951 = vmatprep.subr.bf16.mxu0 %v1722_v7  ;;  %1532 = vmatprep.subr.bf16.mxu1 %v1737_v23 }
 0x16a   :  { %952 = vmatpush1.bf16.msra.mxu0 %v1720_v8  ;;  %1533 = vmatpush3.bf16.msra.mxu1 %v1738_v24 }
 0x16b   :  { %1549 = vmatprep.subr.bf16.mxu1 %v1878_v25 }
 0x16d   :  { %954 = vmatmul.mubr.bf16.vlgmr.msra.gmra.mrb[4].mxu0 %v221_v54  ;;  %v1744_v54 = vld [vmem:[#allocation8 + $0xa8] sm:$0xff]  }
 0x200   :  { %v1490_v26 = vpop.f32.mrb[4].mxu1 }
 0x201   :  { %v1491_v27 = vpop.f32.mrb[5].mxu1 }
 0x202   :  { %v1492_v28 = vadd.f32 %v1491_v27, %v1490_v26  ;;  %v1493_v29 = vpop.f32.mrb[6].mxu1 }
 0x203   :  { %v1494_v30 = vpop.f32.mrb[7].mxu1 }
 0x204   :  { %v997_v36 = vadd.f32 %v1492_v28, %v364_v32 }
 0x220   :  { %v1512_v33 = vpop.f32.mrb[8].mxu1 }
 0x221   :  { %v1513_v34 = vpop.f32.mrb[9].mxu1 }
 0x222   :  { %v1514_v37 = vadd.f32 %v1513_v34, %v1512_v33  ;;  %v1515_v38 = vpop.f32.mrb[10].mxu1 }
 0x223   :  { %v1516_v39 = vpop.f32.mrb[11].mxu1 }
 0x224   :  { %v1037_v40 = vadd.f32 %v1514_v37, %v997_v36 }
 0x226   :  { %v1044_v57 = vmax.f32 %v1037_v40, 0.0 }
 0x228   :  { %v1047_v60 = vpack.c.bf16 %v1044_v57, %v1044_v57 }
 0x240   :  { %v955_v43 = vpop.f32.mrb[4].mxu0 }
 0x241   :  { %v1569_v44 = vadd.f32 %v955_v43, %v356_v41  ;;  %v957_v45 = vpop.f32.mrb[5].mxu0 }
 0x242   :  { %v1570_v46 = vadd.f32 %v957_v45, %v360_v42  ;;  %v959_v47 = vpop.f32.mrb[6].mxu0 }
 0x243   :  { %v1042_v48 = vmax.f32 %v1569_v44, 0.0  ;;  %v960_v35 = vpop.f32.mrb[7].mxu0 }
 0x244   :  { %v1043_v49 = vmax.f32 %v1570_v46, 0.0 }
 0x245   :  { %v1045_v52 = vpack.c.bf16 %v1042_v48, %v1042_v48 }
 0x246   :  { %v1046_v50 = vpack.c.bf16 %v1043_v49, %v1043_v49 }
 0x248   :  { %1279 = vmatprep.mubr.bf16.mxu1 %v1046_v50 }
 0x249   :  { %1280 = vmatmul.mubr.bf16.vlgmr.msra.gmra.mrb[12].mxu1 %v1045_v52 }
 0x24a   :  { %1550 = vmatpush3.bf16.msra.mxu1 %v1739_v51  ;;  %1565 = vmatprep.mubr.msk.bf16.mxu1 %vm1879_vm1, %v1878_v25 }
 0x24b   :  { %1551 = vmatprep.subr.bf16.mxu1 %v1878_v25 }
 0x24e   :  { %1552 = vmatpush3.bf16.msra.mxu1 %v1740_v53 }
 0x24f   :  { %1553 = vmatprep.subr.bf16.mxu1 %v1878_v25 }
 0x252   :  { %1554 = vmatpush3.bf16.msra.mxu1 %v1741_v58 }
 0x253   :  { %1555 = vmatprep.subr.bf16.mxu1 %v1878_v25 }
 0x256   :  { %1556 = vmatpush3.bf16.msra.mxu1 %v1742_v59 }
 0x257   :  { %1557 = vmatprep.subr.bf16.mxu1 %v1878_v25 }
 0x25a   :  { %1558 = vmatpush3.bf16.msra.mxu1 %v1743_v61 }
 0x25b   :  { %1559 = vmatprep.subr.bf16.mxu1 %v1878_v25 }
 0x25e   :  { %1560 = vmatpush3.bf16.msra.mxu1 %v1744_v54 }
 0x25f   :  { %1561 = vmatprep.subr.bf16.mxu1 %v1878_v25 }
 0x262   :  { %1562 = vmatpush3.bf16.msra.mxu1 %v1745_v55 }
 0x263   :  { %1563 = vmatprep.subr.bf16.mxu1 %v1878_v25 }
 0x266   :  { %1564 = vmatpush3.bf16.msra.mxu1 %v1746_v56 }
 0x269   :  { %1566 = vmatmul.mubr.bf16.vlgmr.msra.gmra.mrb[16].mxu1 %v1047_v60 }
 0x31c   :  { %v1534_v62 = vpop.f32.mrb[12].mxu1 }
 0x31d   :  { %v1535_v63 = vpop.f32.mrb[13].mxu1 }
 0x31e   :  { %v1536_v0 = vadd.f32 %v1535_v63, %v1534_v62  ;;  %v1537_v1 = vpop.f32.mrb[14].mxu1 }
 0x31f   :  { %v1538_v2 = vpop.f32.mrb[15].mxu1 }
 0x320   :  { %v1282_v4 = vadd.f32 %v1536_v0, %v1449_v3 }
 0x33c   :  { %v1321_v5 = vpop.f32.mrb[16].mxu1 }
 0x33d   :  { %v1322_v6 = vadd.f32 %v1321_v5, %v1282_v4  ;;  %v1567_v7 = vpop.f32.mrb[17].mxu1 }
 0x33e   :  { %v1324_v8 = vpop.f32.mrb[18].mxu1 }
 0x33f   :  { %1747 = vtanh.f32 %v1322_v6  ;;  %v1568_v9 = vpop.f32.mrb[19].mxu1 }
 0x349   :  { %v1748_v10 = vpop.eup %1747 }
 0x34a   :  { %v1328_v11 = vmul.f32 2.0, %v1748_v10 }
 0x34c   :  { %1329 = vst [vmem:[#allocation10] sm:$0xff] %v1328_v11 }
 0x34d   :  { %1848 = shalt.err (!%p1845_p8)
}
 0x34e   :  { %s1849_s12 = scalar_lea.hbm %s2024_s7, 128 }
 0x34f   :  { %p1850_p9 = scmp.ne.s32.totalorder %s2024_s7, %s1849_s12  ;;  %p1853_p10 = scmp.lt.u32.totalorder %s1849_s12, %s2024_s7 }
 0x351   :  { %p1855_p11 = pnand %p1853_p10, %p1850_p9 }
 0x353   :  { %1858 = shalt.err (!%p1855_p11)
}
 0x354   :  { %1339 = dma.vmem_to_hbm [thread:$0]  %s1337_s9, 128, %s2024_s7, [#allocation4]  }
 0x355   :  { %1865 = dma.done.wait [#allocation4], 128  }
 0x356   :  { %1866 = vsyncadd [#allocation4], 4294967168 }
 0x357   :  { %1343 = vsyncpa [#allocation3], 1 }
 0x358   :  { %1344 = vsyncpa [#allocation6], 1 }
 0x359   :  { %1345 = vsyncpa [#allocation9], 1 }
 0x35a   :  { %1346 = vsyncpa [#allocation4], 1 }

</bundles_post_ra>
